<compile_context>
chip_gen: v6e
topology: v6e:2x2x1
jax: 0.10.0
libtpu: 0.0.40
codegen_flags: <defaults>
</compile_context>

<pallas_src>
import numpy as np
import jax
import jax.numpy as jnp
from jax.experimental import pallas as pl
from jax.experimental.pallas import tpu as pltpu


def _round_up(x, m):
    return ((x + m - 1) // m) * m


# ----------------------------------------------------------------------------
# Fused Pallas kernel: encoder projection + graph assembly + 2-layer GCN
# Processes BB graphs (batch elements) per grid step.
# ----------------------------------------------------------------------------
def _lmgnn_fused_kernel(pooled_ref, wenc_ref, xbase_ref, place_ref,
                        a_ref, invdeg_ref, w1_ref, w2_ref, o_ref):
    """pooled_ref : (BB, CP, HP) bf16  pooled token embeddings + ones bias col
    wenc_ref   : (HP, DP) bf16  encoder projection weight (+ bias row)
    xbase_ref  : (NP, DP) f32   label-node rows + text node-type-emb columns
    place_ref  : (NP, CP) bf16  0/1 placement: text row N+j <- projected row j
    a_ref      : (NP, NP) bf16  0/1 structural adjacency (shared, unnormalized)
    invdeg_ref : (NP, 1)  f32   exact per-row 1/deg normalization
    w1_ref     : (DP, GP) bf16  GCN layer-1 weight
    w2_ref     : (GP, OP) bf16  GCN layer-2 weight
    o_ref      : (BB, NP, OP) f32  per-graph classifier output (lane-dense)
    """
    BB, CP, HP = pooled_ref.shape
    NP = a_ref.shape[0]
    DP = wenc_ref.shape[1]
    GP = w1_ref.shape[1]

    wenc = wenc_ref[...]
    xbase = xbase_ref[...]
    place = place_ref[...]
    a01 = a_ref[...]
    invdeg = invdeg_ref[...]
    w1 = w1_ref[...]
    w2 = w2_ref[...]

    # --- encoder projection on the stacked (BB*CP, HP) operand -------------
    pooled2d = pooled_ref[...].reshape(BB * CP, HP)                    # bf16
    proj = jnp.tanh(jnp.dot(pooled2d, wenc,
                            preferred_element_type=jnp.float32))       # f32
    proj = proj.reshape(BB, CP, DP).astype(jnp.bfloat16)

    # --- node-feature assembly per sub-batch, then stack --------------------
    x_rows = []
    for b in range(BB):
        xb = xbase + jnp.dot(place, proj[b],
                             preferred_element_type=jnp.float32)       # (NP,DP)
        x_rows.append(xb.astype(jnp.bfloat16))
    x = jnp.concatenate(x_rows, axis=0)                                # (BB*NP,DP)

    # --- GCN layer 1: stacked weight matmul, per-graph adjacency product ----
    h0 = jnp.dot(x, w1, preferred_element_type=jnp.float32)            # (BB*NP,GP)
    h0 = h0.reshape(BB, NP, GP)
    h_rows = []
    for b in range(BB):
        hb = jnp.dot(a01, h0[b].astype(jnp.bfloat16),
                     preferred_element_type=jnp.float32)               # (NP,GP)
        h_rows.append(jnp.maximum(hb * invdeg, 0.0).astype(jnp.bfloat16))
    h = jnp.concatenate(h_rows, axis=0)                                # (BB*NP,GP)

    # --- GCN layer 2: stacked weight matmul, per-graph adjacency product ----
    h2 = jnp.dot(h, w2, preferred_element_type=jnp.float32)            # (BB*NP,OP)
    h2 = h2.reshape(BB, NP, -1)
    for b in range(BB):
        ob = jnp.dot(a01, h2[b].astype(jnp.bfloat16),
                     preferred_element_type=jnp.float32)               # (NP,OP)
        o_ref[b, :, :] = ob * invdeg


# ----------------------------------------------------------------------------
# LMGNN
# ----------------------------------------------------------------------------
class LMGNN:
    def __init__(self, key, *, vocab_size, hidden_size, d_model, num_labels,
                 gcn_hidden, out_dim):
        assert d_model > hidden_size
        self.hidden_size = hidden_size
        self.d_model = d_model
        self.out_dim = out_dim
        extra = d_model - hidden_size
        ks = jax.random.split(key, 8)

        # padded (lane-dense) dimensions
        self.HP = _round_up(hidden_size + 1, 128)   # +1 = folded-bias column
        self.DP = _round_up(d_model, 128)
        self.GP = _round_up(gcn_hidden, 128)
        self.OP = _round_up(out_dim, 128)

        # --- synthetic encoder params ---
        # TODO(synk): the reference wraps an opaque pretrained encoder_model;
        # here it is a synthetic embedding + masked mean-pool + linear + tanh.
        self.embed_table = jax.random.normal(
            ks[0], (vocab_size, hidden_size), dtype=jnp.float32) * 0.02
        w_enc = jax.random.normal(
            ks[1], (hidden_size, hidden_size), dtype=jnp.float32) * (1.0 / np.sqrt(hidden_size))
        b_enc = np.zeros((hidden_size,), dtype=np.float32)
        wenc_p = np.zeros((self.HP, self.DP), dtype=np.float32)
        wenc_p[:hidden_size, :hidden_size] = np.asarray(w_enc)
        wenc_p[hidden_size, :hidden_size] = b_enc          # bias row (ones col)
        self.w_enc_p = jnp.asarray(wenc_p, dtype=jnp.bfloat16)

        # --- node type embeddings: randn(2, extra) then xavier_normal_ ---
        fan_in, fan_out = extra, 2
        xavier_std = float(np.sqrt(2.0 / (fan_in + fan_out)))
        self.node_type_embeddings = (
            jax.random.normal(ks[2], (2, extra), dtype=jnp.float32) * xavier_std)

        # --- label graph: nodes (num_labels, hidden_size), chain + self edges
        label_graph_nodes = jax.random.normal(
            ks[3], (num_labels, hidden_size), dtype=jnp.float32)
        e = []
        for i in range(num_labels - 1):
            e.append([i, i + 1])
            e.append([i + 1, i])
        for i in range(num_labels):
            e.append([i, i])
        self.label_edges = np.asarray(e, dtype=np.int64).T          # (2, E)

        le = jnp.tile(self.node_type_embeddings[0][None, :], (num_labels, 1))
        self.label_nodes = jnp.concatenate([label_graph_nodes, le], axis=1)
        self.num_nodes = self.label_nodes.shape[0]

        # --- synthetic GCN classifier params (padded, bf16 matmul operands) --
        # TODO(synk): the reference classifier_model is opaque; implemented as
        # a 2-layer mean-aggregation GCN (out = A_hat @ relu(A_hat @ X W1) W2).
        w1 = jax.random.normal(ks[4], (d_model, gcn_hidden),
                               dtype=jnp.float32) * (1.0 / np.sqrt(d_model))
        w2 = jax.random.normal(ks[5], (gcn_hidden, out_dim),
                               dtype=jnp.float32) * (1.0 / np.sqrt(gcn_hidden))
        w1_p = np.zeros((self.DP, self.GP), dtype=np.float32)
        w1_p[:d_model, :gcn_hidden] = np.asarray(w1)
        w2_p = np.zeros((self.GP, self.OP), dtype=np.float32)
        w2_p[:gcn_hidden, :out_dim] = np.asarray(w2)
        self.w1_p = jnp.asarray(w1_p, dtype=jnp.bfloat16)
        self.w2_p = jnp.asarray(w2_p, dtype=jnp.bfloat16)

        self._graph_cache = {}
        self._use_buffered = hasattr(pl, "Buffered")
        self._jitted_forward = jax.jit(self._device_forward)

    # ---------------- helpers ------------------------------------------------
    def _resident_spec(self, shape):
        """BlockSpec for an operand resident in VMEM across all grid steps."""
        index_map = lambda i, _s=shape: (0,) * len(_s)
        if self._use_buffered:
            try:
                return pl.BlockSpec(shape, index_map,
                                    pipeline_mode=pl.Buffered(1))
            except TypeError:
                pass
        return pl.BlockSpec(shape, index_map)

    @staticmethod
    def _choose_bb(B, NP):
        """Graphs per grid step: stack rows toward ~256 (MXU M-dim) but keep
        >= 2 grid steps so ("parallel",) can use both v7x TensorCores."""
        if B <= 1:
            return 1
        cap = max(1, 256 // max(NP, 1))
        best = 1
        for bb in range(1, B + 1):
            if bb > cap:
                break
            if B % bb == 0 and (B // bb) >= 2:
                best = bb
        return best

    # ---------------- structural graph, cached per chunk count C -------------
    def _graph(self, C):
        if C in self._graph_cache:
            return self._graph_cache[C]
        N = self.num_nodes
        n = N + C
        NP = _round_up(n, 16)          # 16-row padding: bf16 (16,128) tiles
        CP = _round_up(C, 16)

        # edge list, exactly mirroring the reference gen_nodes_and_edges():
        extra_edges = [[i, N + j] for i in range(N) for j in range(C)]
        extra_rev_edges = [[j, i] for i, j in extra_edges]
        extra_self_edges = [[N + i, N + i] for i in range(C)]
        extra = np.asarray(extra_edges + extra_rev_edges + extra_self_edges,
                           dtype=np.int64).T
        edge_index = np.concatenate([self.label_edges, extra], axis=1)
        src, dst = edge_index[0], edge_index[1]

        adj = np.zeros((NP, NP), dtype=np.float32)
        np.add.at(adj, (dst, src), 1.0)            # small int counts (0/1 here)
        deg = np.maximum(adj.sum(axis=1, keepdims=True), 1.0)
        a01 = jnp.asarray(adj, dtype=jnp.bfloat16)          # exact small ints
        invdeg = jnp.asarray(1.0 / deg, dtype=jnp.float32)  # (NP, 1) exact f32

        # static node features: label rows + node-type embedding of text rows
        H, D = self.hidden_size, self.d_model
        xbase = np.zeros((NP, self.DP), dtype=np.float32)
        xbase[:N, :D] = np.asarray(self.label_nodes, dtype=np.float32)
        xbase[N:n, H:D] = np.asarray(self.node_type_embeddings[1],
                                     dtype=np.float32)
        xbase = jnp.asarray(xbase)

        # placement matrix: text row N+j receives projected chunk j (0/1, bf16)
        place = np.zeros((NP, CP), dtype=np.float32)
        place[np.arange(N, n), np.arange(C)] = 1.0
        place = jnp.asarray(place, dtype=jnp.bfloat16)

        self._graph_cache[C] = (a01, invdeg, xbase, place)
        return self._graph_cache[C]

    # ---------------- jitted device path (pooling + fused Pallas kernel) -----
    def _device_forward(self, ids, mask, a01, invdeg, xbase, place):
        B, C, L = ids.shape
        H = self.hidden_size
        HP, DP, GP, OP = self.HP, self.DP, self.GP, self.OP
        NP = xbase.shape[0]
        CP = place.shape[1]

        # synthetic encoder front-end: embedding lookup + masked mean pooling
        emb = jnp.take(self.embed_table, ids.reshape(-1), axis=0)
        emb = emb.reshape(B, C, L, H)
        m = mask[..., None].astype(jnp.float32)
        pooled = (emb * m).sum(axis=2) / jnp.maximum(m.sum(axis=2), 1.0)  # (B,C,H)

        # pad to lane-dense (B, CP, HP), inject folded-bias ones column, bf16
        pooled_p = jnp.zeros((B, CP, HP), dtype=jnp.float32)
        pooled_p = pooled_p.at[:, :C, :H].set(pooled)
        pooled_p = pooled_p.at[:, :C, H].set(1.0)
        pooled_p = pooled_p.astype(jnp.bfloat16)

        BB = self._choose_bb(B, NP)
        steps = B // BB

        # advisory cost estimate (lets XLA overlap pooling with the kernel)
        flops = 2 * B * (CP * HP * DP + NP * CP * DP + NP * DP * GP
                         + NP * NP * GP + NP * GP * OP + NP * NP * OP)
        bytes_accessed = (B * CP * HP * 2 + B * NP * OP * 4
                          + HP * DP * 2 + NP * DP * 4 + NP * CP * 2
                          + NP * NP * 2 + NP * 4 + DP * GP * 2 + GP * OP * 2)
        cost = (pl.CostEstimate(flops=flops, transcendentals=B * CP * DP,
                                bytes_accessed=bytes_accessed)
                if hasattr(pl, "CostEstimate") else None)

        # explicit VMEM budget (v5e default scoped limit is only 16 MiB)
        resident = (HP * DP * 2 + NP * DP * 4 + NP * CP * 2 + NP * NP * 2
                    + NP * 4 + DP * GP * 2 + GP * OP * 2)
        streamed = 2 * (BB * CP * HP * 2 + BB * NP * OP * 4)   # double-buffered
        work = BB * NP * (DP + GP + OP) * 6                    # f32/bf16 temps
        vmem_limit = int(min(max(2 * resident + streamed + work + (8 << 20),
                                 32 << 20), 128 << 20))

        out_p = pl.pallas_call(
            _lmgnn_fused_kernel,
            out_shape=jax.ShapeDtypeStruct((B, NP, OP), jnp.float32),
            grid=(steps,),
            in_specs=[
                pl.BlockSpec((BB, CP, HP), lambda i: (i, 0, 0)),  # pooled (stream)
                self._resident_spec((HP, DP)),                    # w_enc
                self._resident_spec((NP, DP)),                    # xbase
                self._resident_spec((NP, CP)),                    # place
                self._resident_spec((NP, NP)),                    # adjacency 0/1
                self._resident_spec((NP, 1)),                     # 1/deg
                self._resident_spec((DP, GP)),                    # W1
                self._resident_spec((GP, OP)),                    # W2
            ],
            out_specs=pl.BlockSpec((BB, NP, OP), lambda i: (i, 0, 0)),
            compiler_params=pltpu.CompilerParams(
                dimension_semantics=("parallel",),
                vmem_limit_bytes=vmem_limit),
            cost_estimate=cost,
        )(pooled_p, self.w_enc_p, xbase, place, a01, invdeg,
          self.w1_p, self.w2_p)

        # strip row / lane padding; ordering per batch = [label nodes, text nodes]
        n = self.num_nodes + C
        return out_p[:, :n, :self.out_dim].reshape(B * n, self.out_dim)

    # ---------------- forward ----------------
    def forward(self, **input_ids):
        # nchunks / meta_data are accepted for interface parity (unused, as in
        # the reference wrapper semantics implemented here).
        ids = input_ids['input_ids']
        mask = input_ids['attention_mask']
        _, C, _ = ids.shape
        graph = self._graph(C)
        try:
            return self._jitted_forward(ids, mask, *graph)
        except Exception:
            if self._use_buffered:
                # Fallback if this jax build rejects pipeline_mode=pl.Buffered(1)
                # for resident operands: rebuild with default double-buffering.
                self._use_buffered = False
                self._jitted_forward = jax.jit(self._device_forward)
                return self._jitted_forward(ids, mask, *graph)
            raise


# ----------------------------------------------------------------------------
# main
# ----------------------------------------------------------------------------
if __name__ == "__main__":
    key = jax.random.PRNGKey(0)
    k_model, k_ids = jax.random.split(key)

    B, C, L = 4, 4, 8       # B=4 -> BB=2 graphs per step, 2 grid steps
    vocab_size = 50
    hidden_size = 24
    d_model = 32            # extra (node-type) dim = 8
    num_labels = 6
    gcn_hidden = 32
    out_dim = 16

    model = LMGNN(k_model, vocab_size=vocab_size, hidden_size=hidden_size,
                  d_model=d_model, num_labels=num_labels,
                  gcn_hidden=gcn_hidden, out_dim=out_dim)

    input_ids = jax.random.randint(k_ids, (B, C, L), 0, vocab_size, dtype=jnp.int32)
    attention_mask = jnp.ones((B, C, L), dtype=jnp.float32)
    nchunks = jnp.full((B,), C, dtype=jnp.int32)
    meta_data = jnp.zeros((B, 2), dtype=jnp.int32)

    out = model.forward(input_ids=input_ids,
                        attention_mask=attention_mask,
                        nchunks=nchunks,
                        meta_data=meta_data)
    out = jax.block_until_ready(out)

    expected_nodes = B * (num_labels + C)
    assert out.shape == (expected_nodes, out_dim), out.shape
    assert bool(jnp.all(jnp.isfinite(out)))
    print("KERNEL_OK")
</pallas_src>

<mosaic_0001>
module attributes {stable_mosaic.version = 11 : i64} {
  func.func @_lmgnn_fused_kernel(%arg0: i32, %arg1: memref<2x16x128xbf16, #tpu.memory_space<vmem>>, %arg2: memref<128x128xbf16, #tpu.memory_space<vmem>>, %arg3: memref<16x128xf32, #tpu.memory_space<vmem>>, %arg4: memref<16x16xbf16, #tpu.memory_space<vmem>>, %arg5: memref<16x16xbf16, #tpu.memory_space<vmem>>, %arg6: memref<16x1xf32, #tpu.memory_space<vmem>>, %arg7: memref<128x128xbf16, #tpu.memory_space<vmem>>, %arg8: memref<128x128xbf16, #tpu.memory_space<vmem>>, %arg9: memref<2x16x128xf32, #tpu.memory_space<vmem>>) attributes {dimension_semantics = [#tpu.dimension_semantics<parallel>], iteration_bounds = array<i64: 2>, scalar_prefetch = 0 : i64, scratch_operands = 0 : i64, tpu.core_type = #tpu.core_type<tc>, window_params = [{transform_indices = @transform_0, window_bounds = array<i64: 2, 16, 128>}, {pipeline_mode = #tpu.pipeline_mode<synchronous>, transform_indices = @transform_1, window_bounds = array<i64: 128, 128>}, {pipeline_mode = #tpu.pipeline_mode<synchronous>, transform_indices = @transform_2, window_bounds = array<i64: 16, 128>}, {pipeline_mode = #tpu.pipeline_mode<synchronous>, transform_indices = @transform_3, window_bounds = array<i64: 16, 16>}, {pipeline_mode = #tpu.pipeline_mode<synchronous>, transform_indices = @transform_4, window_bounds = array<i64: 16, 16>}, {pipeline_mode = #tpu.pipeline_mode<synchronous>, transform_indices = @transform_5, window_bounds = array<i64: 16, 1>}, {pipeline_mode = #tpu.pipeline_mode<synchronous>, transform_indices = @transform_6, window_bounds = array<i64: 128, 128>}, {pipeline_mode = #tpu.pipeline_mode<synchronous>, transform_indices = @transform_7, window_bounds = array<i64: 128, 128>}, {transform_indices = @transform_8, window_bounds = array<i64: 2, 16, 128>}]} {
    %c0 = arith.constant 0 : index
    %c0_0 = arith.constant 0 : index
    %0 = vector.load %arg2[%c0, %c0_0] : memref<128x128xbf16, #tpu.memory_space<vmem>>, vector<128x128xbf16>
    %c0_1 = arith.constant 0 : index
    %c0_2 = arith.constant 0 : index
    %1 = vector.load %arg3[%c0_1, %c0_2] : memref<16x128xf32, #tpu.memory_space<vmem>>, vector<16x128xf32>
    %c0_3 = arith.constant 0 : index
    %c0_4 = arith.constant 0 : index
    %2 = vector.load %arg4[%c0_3, %c0_4] : memref<16x16xbf16, #tpu.memory_space<vmem>>, vector<16x16xbf16>
    %c0_5 = arith.constant 0 : index
    %c0_6 = arith.constant 0 : index
    %3 = vector.load %arg5[%c0_5, %c0_6] : memref<16x16xbf16, #tpu.memory_space<vmem>>, vector<16x16xbf16>
    %c0_7 = arith.constant 0 : index
    %c0_8 = arith.constant 0 : index
    %4 = vector.load %arg6[%c0_7, %c0_8] : memref<16x1xf32, #tpu.memory_space<vmem>>, vector<16x1xf32>
    %c0_9 = arith.constant 0 : index
    %c0_10 = arith.constant 0 : index
    %5 = vector.load %arg7[%c0_9, %c0_10] : memref<128x128xbf16, #tpu.memory_space<vmem>>, vector<128x128xbf16>
    %c0_11 = arith.constant 0 : index
    %c0_12 = arith.constant 0 : index
    %6 = vector.load %arg8[%c0_11, %c0_12] : memref<128x128xbf16, #tpu.memory_space<vmem>>, vector<128x128xbf16>
    %c0_13 = arith.constant 0 : index
    %c0_14 = arith.constant 0 : index
    %c0_15 = arith.constant 0 : index
    %7 = vector.load %arg1[%c0_13, %c0_14, %c0_15] : memref<2x16x128xbf16, #tpu.memory_space<vmem>>, vector<2x16x128xbf16>
    %8 = vector.shape_cast %7 : vector<2x16x128xbf16> to vector<32x128xbf16>
    %cst = arith.constant dense<0.000000e+00> : vector<32x128xf32>
    %9 = tpu.matmul %8, %0, %cst {dimension_numbers = #tpu.dot_dimension_numbers<[1], [0], [0], [1], [0, 0, 1, 1], [], []>} : vector<32x128xbf16>, vector<128x128xbf16>, vector<32x128xf32> -> vector<32x128xf32>
    %10 = math.tanh %9 : vector<32x128xf32>
    %11 = vector.shape_cast %10 : vector<32x128xf32> to vector<2x16x128xf32>
    %12 = arith.truncf %11 : vector<2x16x128xf32> to vector<2x16x128xbf16>
    %13 = vector.extract_strided_slice %12 {offsets = [0, 0, 0], sizes = [1, 16, 128], strides = [1, 1, 1]} : vector<2x16x128xbf16> to vector<1x16x128xbf16>
    %14 = vector.shape_cast %13 : vector<1x16x128xbf16> to vector<16x128xbf16>
    %cst_16 = arith.constant dense<0.000000e+00> : vector<16x128xf32>
    %15 = tpu.matmul %2, %14, %cst_16 {dimension_numbers = #tpu.dot_dimension_numbers<[1], [0], [0], [1], [0, 0, 1, 1], [], []>} : vector<16x16xbf16>, vector<16x128xbf16>, vector<16x128xf32> -> vector<16x128xf32>
    %16 = arith.addf %1, %15 : vector<16x128xf32>
    %17 = arith.truncf %16 : vector<16x128xf32> to vector<16x128xbf16>
    %18 = vector.extract_strided_slice %12 {offsets = [1, 0, 0], sizes = [1, 16, 128], strides = [1, 1, 1]} : vector<2x16x128xbf16> to vector<1x16x128xbf16>
    %19 = vector.shape_cast %18 : vector<1x16x128xbf16> to vector<16x128xbf16>
    %cst_17 = arith.constant dense<0.000000e+00> : vector<16x128xf32>
    %20 = tpu.matmul %2, %19, %cst_17 {dimension_numbers = #tpu.dot_dimension_numbers<[1], [0], [0], [1], [0, 0, 1, 1], [], []>} : vector<16x16xbf16>, vector<16x128xbf16>, vector<16x128xf32> -> vector<16x128xf32>
    %21 = arith.addf %1, %20 : vector<16x128xf32>
    %22 = arith.truncf %21 : vector<16x128xf32> to vector<16x128xbf16>
    %23 = tpu.concatenate %17, %22 in 0 : vector<16x128xbf16>, vector<16x128xbf16> -> vector<32x128xbf16>
    %cst_18 = arith.constant dense<0.000000e+00> : vector<32x128xf32>
    %24 = tpu.matmul %23, %5, %cst_18 {dimension_numbers = #tpu.dot_dimension_numbers<[1], [0], [0], [1], [0, 0, 1, 1], [], []>} : vector<32x128xbf16>, vector<128x128xbf16>, vector<32x128xf32> -> vector<32x128xf32>
    %25 = vector.shape_cast %24 : vector<32x128xf32> to vector<2x16x128xf32>
    %26 = vector.extract_strided_slice %25 {offsets = [0, 0, 0], sizes = [1, 16, 128], strides = [1, 1, 1]} : vector<2x16x128xf32> to vector<1x16x128xf32>
    %27 = vector.shape_cast %26 : vector<1x16x128xf32> to vector<16x128xf32>
    %28 = arith.truncf %27 : vector<16x128xf32> to vector<16x128xbf16>
    %cst_19 = arith.constant dense<0.000000e+00> : vector<16x128xf32>
    %29 = tpu.matmul %3, %28, %cst_19 {dimension_numbers = #tpu.dot_dimension_numbers<[1], [0], [0], [1], [0, 0, 1, 1], [], []>} : vector<16x16xbf16>, vector<16x128xbf16>, vector<16x128xf32> -> vector<16x128xf32>
    %30 = vector.broadcast %4 : vector<16x1xf32> to vector<16x128xf32>
    %31 = arith.mulf %29, %30 : vector<16x128xf32>
    %cst_20 = arith.constant 0.000000e+00 : f32
    %32 = vector.broadcast %cst_20 : f32 to vector<16x128xf32>
    %33 = arith.maximumf %31, %32 : vector<16x128xf32>
    %34 = arith.truncf %33 : vector<16x128xf32> to vector<16x128xbf16>
    %35 = vector.extract_strided_slice %25 {offsets = [1, 0, 0], sizes = [1, 16, 128], strides = [1, 1, 1]} : vector<2x16x128xf32> to vector<1x16x128xf32>
    %36 = vector.shape_cast %35 : vector<1x16x128xf32> to vector<16x128xf32>
    %37 = arith.truncf %36 : vector<16x128xf32> to vector<16x128xbf16>
    %cst_21 = arith.constant dense<0.000000e+00> : vector<16x128xf32>
    %38 = tpu.matmul %3, %37, %cst_21 {dimension_numbers = #tpu.dot_dimension_numbers<[1], [0], [0], [1], [0, 0, 1, 1], [], []>} : vector<16x16xbf16>, vector<16x128xbf16>, vector<16x128xf32> -> vector<16x128xf32>
    %39 = vector.broadcast %4 : vector<16x1xf32> to vector<16x128xf32>
    %40 = arith.mulf %38, %39 : vector<16x128xf32>
    %cst_22 = arith.constant 0.000000e+00 : f32
    %41 = vector.broadcast %cst_22 : f32 to vector<16x128xf32>
    %42 = arith.maximumf %40, %41 : vector<16x128xf32>
    %43 = arith.truncf %42 : vector<16x128xf32> to vector<16x128xbf16>
    %44 = tpu.concatenate %34, %43 in 0 : vector<16x128xbf16>, vector<16x128xbf16> -> vector<32x128xbf16>
    %cst_23 = arith.constant dense<0.000000e+00> : vector<32x128xf32>
    %45 = tpu.matmul %44, %6, %cst_23 {dimension_numbers = #tpu.dot_dimension_numbers<[1], [0], [0], [1], [0, 0, 1, 1], [], []>} : vector<32x128xbf16>, vector<128x128xbf16>, vector<32x128xf32> -> vector<32x128xf32>
    %46 = vector.shape_cast %45 : vector<32x128xf32> to vector<2x16x128xf32>
    %47 = vector.extract_strided_slice %46 {offsets = [0, 0, 0], sizes = [1, 16, 128], strides = [1, 1, 1]} : vector<2x16x128xf32> to vector<1x16x128xf32>
    %48 = vector.shape_cast %47 : vector<1x16x128xf32> to vector<16x128xf32>
    %49 = arith.truncf %48 : vector<16x128xf32> to vector<16x128xbf16>
    %cst_24 = arith.constant dense<0.000000e+00> : vector<16x128xf32>
    %50 = tpu.matmul %3, %49, %cst_24 {dimension_numbers = #tpu.dot_dimension_numbers<[1], [0], [0], [1], [0, 0, 1, 1], [], []>} : vector<16x16xbf16>, vector<16x128xbf16>, vector<16x128xf32> -> vector<16x128xf32>
    %51 = vector.broadcast %4 : vector<16x1xf32> to vector<16x128xf32>
    %52 = arith.mulf %50, %51 : vector<16x128xf32>
    %c0_25 = arith.constant 0 : index
    %c0_26 = arith.constant 0 : index
    %c0_27 = arith.constant 0 : index
    %53 = vector.load %arg9[%c0_25, %c0_26, %c0_27] : memref<2x16x128xf32, #tpu.memory_space<vmem>>, vector<1x16x128xf32>
    %54 = vector.shape_cast %53 : vector<1x16x128xf32> to vector<16x128xf32>
    %55 = vector.shape_cast %52 : vector<16x128xf32> to vector<1x16x128xf32>
    tpu.vector_store %arg9[%c0_25, %c0_26, %c0_27], %55 {strides = array<i32>} : memref<2x16x128xf32, #tpu.memory_space<vmem>>, vector<1x16x128xf32>,
    %56 = vector.extract_strided_slice %46 {offsets = [1, 0, 0], sizes = [1, 16, 128], strides = [1, 1, 1]} : vector<2x16x128xf32> to vector<1x16x128xf32>
    %57 = vector.shape_cast %56 : vector<1x16x128xf32> to vector<16x128xf32>
    %58 = arith.truncf %57 : vector<16x128xf32> to vector<16x128xbf16>
    %cst_28 = arith.constant dense<0.000000e+00> : vector<16x128xf32>
    %59 = tpu.matmul %3, %58, %cst_28 {dimension_numbers = #tpu.dot_dimension_numbers<[1], [0], [0], [1], [0, 0, 1, 1], [], []>} : vector<16x16xbf16>, vector<16x128xbf16>, vector<16x128xf32> -> vector<16x128xf32>
    %60 = vector.broadcast %4 : vector<16x1xf32> to vector<16x128xf32>
    %61 = arith.mulf %59, %60 : vector<16x128xf32>
    %c1 = arith.constant 1 : index
    %c0_29 = arith.constant 0 : index
    %c0_30 = arith.constant 0 : index
    %62 = vector.load %arg9[%c1, %c0_29, %c0_30] : memref<2x16x128xf32, #tpu.memory_space<vmem>>, vector<1x16x128xf32>
    %63 = vector.shape_cast %62 : vector<1x16x128xf32> to vector<16x128xf32>
    %64 = vector.shape_cast %61 : vector<16x128xf32> to vector<1x16x128xf32>
    tpu.vector_store %arg9[%c1, %c0_29, %c0_30], %64 {strides = array<i32>} : memref<2x16x128xf32, #tpu.memory_space<vmem>>, vector<1x16x128xf32>,
    return
  }
  func.func @transform_0(%arg0: i32) -> (i32, i32, i32) {
    %c0_i32 = arith.constant 0 : i32
    %c0_i32_0 = arith.constant 0 : i32
    %c0_i32_1 = arith.constant 0 : i32
    return %arg0, %c0_i32, %c0_i32_0 : i32, i32, i32
  }
  func.func @transform_1(%arg0: i32) -> (i32, i32) {
    %c0_i32 = arith.constant 0 : i32
    %c0_i32_0 = arith.constant 0 : i32
    %c0_i32_1 = arith.constant 0 : i32
    return %c0_i32, %c0_i32_0 : i32, i32
  }
  func.func @transform_2(%arg0: i32) -> (i32, i32) {
    %c0_i32 = arith.constant 0 : i32
    %c0_i32_0 = arith.constant 0 : i32
    %c0_i32_1 = arith.constant 0 : i32
    return %c0_i32, %c0_i32_0 : i32, i32
  }
  func.func @transform_3(%arg0: i32) -> (i32, i32) {
    %c0_i32 = arith.constant 0 : i32
    %c0_i32_0 = arith.constant 0 : i32
    %c0_i32_1 = arith.constant 0 : i32
    return %c0_i32, %c0_i32_0 : i32, i32
  }
  func.func @transform_4(%arg0: i32) -> (i32, i32) {
    %c0_i32 = arith.constant 0 : i32
    %c0_i32_0 = arith.constant 0 : i32
    %c0_i32_1 = arith.constant 0 : i32
    return %c0_i32, %c0_i32_0 : i32, i32
  }
  func.func @transform_5(%arg0: i32) -> (i32, i32) {
    %c0_i32 = arith.constant 0 : i32
    %c0_i32_0 = arith.constant 0 : i32
    %c0_i32_1 = arith.constant 0 : i32
    return %c0_i32, %c0_i32_0 : i32, i32
  }
  func.func @transform_6(%arg0: i32) -> (i32, i32) {
    %c0_i32 = arith.constant 0 : i32
    %c0_i32_0 = arith.constant 0 : i32
    %c0_i32_1 = arith.constant 0 : i32
    return %c0_i32, %c0_i32_0 : i32, i32
  }
  func.func @transform_7(%arg0: i32) -> (i32, i32) {
    %c0_i32 = arith.constant 0 : i32
    %c0_i32_0 = arith.constant 0 : i32
    %c0_i32_1 = arith.constant 0 : i32
    return %c0_i32, %c0_i32_0 : i32, i32
  }
  func.func @transform_8(%arg0: i32) -> (i32, i32, i32) {
    %c0_i32 = arith.constant 0 : i32
    %c0_i32_0 = arith.constant 0 : i32
    %c0_i32_1 = arith.constant 0 : i32
    return %arg0, %c0_i32, %c0_i32_0 : i32, i32, i32
  }
}

</mosaic_0001>

<bundles_post_ra>
// kernel: _device_forward.1
= control target key start
LH: loop header
LB: loop body
LE: loop exit
PB: predicated region body
PF: predicated region fallthrough
CT: control target
= control target key end

     0   :  { %s1337_s27 = smov 0   ;;  %s1472_s0 = inlined_call_operand.vmem [shape: bf16[4,16,128], index: 0, kind: input, shape index: {}]   ;;  %s1473_s1 = inlined_call_operand.vmem [shape: bf16[128,128], index: 1, kind: input, shape index: {}]   ;;  %s1474_s2 = inlined_call_operand.vmem [shape: f32[16,128], index: 2, kind: input, shape index: {}]   ;;  %s1475_s3 = inlined_call_operand.vmem [shape: bf16[16,16], index: 3, kind: input, shape index: {}]   ;;  %s1476_s4 = inlined_call_operand.vmem [shape: bf16[16,16], index: 4, kind: input, shape index: {}]   ;;  %s1477_s5 = inlined_call_operand.vmem [shape: f32[16,1], index: 5, kind: input, shape index: {}]   ;;  %s1478_s6 = inlined_call_operand.vmem [shape: bf16[128,128], index: 6, kind: input, shape index: {}]   ;;  %s1479_s7 = inlined_call_operand.vmem [shape: bf16[128,128], index: 7, kind: input, shape index: {}]   ;;  %s1480_s8 = inlined_call_operand.vmem [shape: f32[4,16,128], index: 8, kind: output, shape index: {}]  }
   0x1 LB: > { %s1044_s28 = sadd.s32 4294967295, %s1287_s27   ;;  %p1048_p0 = scmp.ge.s32.totalorder %s1287_s27, 1  ;;  %s1287_s27 = sphi %s1337_s27, %s18_s27  }
   0x2   : > { %p264_p1 = scmp.lt.s32.totalorder %s1287_s27, 3 }
   0x4   : > { %p265_p2 = pnand %p1048_p0, %p264_p1 }
   0x5   : > { %s1049_s9 = sshll.u32 (!%p265_p2), %s1044_s28, 1 }
   0x6   : > { %268 = sbr.rel (%p265_p2) target bundleno = 1291 (0x50b), region = 52  ;;  %p301_p3 = scmp.lt.s32.totalorder (!%p265_p2), %s1049_s9, 3 }
   0xb   : > { %v1245_v0 = vld [vmem:[%s1473_s1 + $0x38] sm:$0xff]   ;;  %v1246_v1 = vld [vmem:[%s1473_s1 + $0x30] sm:$0xff]   ;;  %s1482_s9 = smov (!%p301_p3, %s1049_s9), 3  ;;  %v1247_v2 = vld [vmem:[%s1473_s1 + $0x28] sm:$0xff]   ;;  %v1289_v10 = vmov 0.0   ;;  %vm1290_vm0 = vmmov 0  }
   0xc   : > { %1137 = vmatprep.subr.bf16.mxu0 %v1245_v0  ;;  %s1093_s14 = sshll.u32 %s1482_s9, 3  ;;  %v1248_v3 = vld [vmem:[%s1473_s1 + $0x20] sm:$0xff]   ;;  %v1249_v5 = vld [vmem:[%s1473_s1 + $0x18] sm:$0xff]   ;;  %v1250_v6 = vld [vmem:[%s1473_s1 + $0x10] sm:$0xff]   ;;  %1163 = vmatprep.subr.bf16.mxu1 %v1289_v10  ;;  %vm495_vm1 = vcmask 130048   ;;  %v1291_v48 = vmov 0  }
   0xd   : > { %1138 = vmatpush3.bf16.msra.mxu0 %v1245_v0  ;;  %s305_s17 = scalar_lea.vmem %s1472_s0, %s1093_s14  ;;  %v1251_v7 = vld [vmem:[%s1473_s1 + $0x8] sm:$0xff]   ;;  %v1252_v8 = vld [vmem:[%s1473_s1] sm:$0xff]   ;;  %1165 = vmatprep.mubr.msk.bf16.mxu1 %vm1290_vm0, %v1289_v10  ;;  %v1256_v17 = vld [vmem:[%s1478_s6 + $0x38] sm:$0xff]   ;;  %s1094_s12 = sshll.u32 %s1482_s9, 4 }
   0xe   : > { %1139 = vmatprep.subr.bf16.mxu0 %v1246_v1  ;;  %v1253_v4 = vld [vmem:[%s305_s17] sm:$0xff]   ;;  %v1254_v9 = vld [vmem:[%s305_s17 + $0x8] sm:$0xff]   ;;  %v1257_v23 = vld [vmem:[%s1478_s6 + $0x30] sm:$0xff]   ;;  %1244 = vset.pattern.permute.xlu0 %v1291_v48  ;;  %s312_s15 = scalar_lea.vmem %s1480_s8, %s1094_s12 }
   0xf   : > { %1153 = vmatprep.mubr.bf16.mxu0 %v1253_v4  ;;  %v1255_v21 = vld [vmem:[%s1475_s3] sm:$0xff]   ;;  %v1258_v24 = vld [vmem:[%s1478_s6 + $0x28] sm:$0xff]   ;;  %v1260_v26 = vld [vmem:[%s1478_s6 + $0x18] sm:$0xff]  }
  0x10   : > { %v1259_v25 = vld [vmem:[%s1478_s6 + $0x20] sm:$0xff]   ;;  %v1261_v27 = vld [vmem:[%s1478_s6 + $0x10] sm:$0xff]   ;;  %v1262_v28 = vld [vmem:[%s1478_s6 + $0x8] sm:$0xff]  }
  0x11   : > { %1140 = vmatpush3.bf16.msra.mxu0 %v1246_v1  ;;  %v1263_v29 = vld [vmem:[%s1478_s6] sm:$0xff]   ;;  %v332_v34 = vld [vmem:[%s1474_s2 + $0x8] sm:$0xff]  ;;  %v1265_v47 = vld [vmem:[%s1479_s7 + $0x38] sm:$0xff]  }
  0x12   : > { %1141 = vmatprep.subr.bf16.mxu0 %v1247_v2  ;;  %v331_v33 = vld [vmem:[%s1474_s2] sm:$0xff]  ;;  %v1266_v49 = vld [vmem:[%s1479_s7 + $0x30] sm:$0xff]   ;;  %v338_v50 = vld [vmem:[%s1477_s5 + $0x8] sm:$0xff] }
  0x13   : > { %v337_v46 = vld [vmem:[%s1477_s5] sm:$0xff]  ;;  %v1267_v51 = vld [vmem:[%s1479_s7 + $0x28] sm:$0xff]   ;;  %v1269_v60 = vld [vmem:[%s1479_s7 + $0x18] sm:$0xff]  }
  0x14   : > { %736 = vperm.xlu0 %1244, %v337_v46   ;;  %v1268_v52 = vld [vmem:[%s1479_s7 + $0x20] sm:$0xff]   ;;  %v1270_v61 = vld [vmem:[%s1479_s7 + $0x10] sm:$0xff]   ;;  %v1271_v62 = vld [vmem:[%s1479_s7 + $0x8] sm:$0xff]  }
  0x15   : > { %1142 = vmatpush3.bf16.msra.mxu0 %v1247_v2  ;;  %v1264_v58 = vld [vmem:[%s1476_s4] sm:$0xff]  }
  0x16   : > { %1143 = vmatprep.subr.bf16.mxu0 %v1248_v3  ;;  %v1272_v63 = vld [vmem:[%s1479_s7] sm:$0xff]  }
  0x18   : > { %741 = vperm.xlu0 %1244, %v338_v50  }
  0x19   : > { %1144 = vmatpush3.bf16.msra.mxu0 %v1248_v3 }
  0x1a   : > { %1145 = vmatprep.subr.bf16.mxu0 %v1249_v5 }
  0x1d   : > { %1146 = vmatpush3.bf16.msra.mxu0 %v1249_v5 }
  0x1e   : > { %1147 = vmatprep.subr.bf16.mxu0 %v1250_v6 }
  0x21   : > { %1148 = vmatpush3.bf16.msra.mxu0 %v1250_v6 }
  0x22   : > { %1149 = vmatprep.subr.bf16.mxu0 %v1251_v7 }
  0x25   : > { %1150 = vmatpush3.bf16.msra.mxu0 %v1251_v7 }
  0x26   : > { %1151 = vmatprep.subr.bf16.mxu0 %v1252_v8 }
  0x29   : > { %1152 = vmatpush3.bf16.msra.mxu0 %v1252_v8 }
  0x2a   : > { %1157 = vmatprep.subr.bf16.mxu0 %v1289_v10 }
  0x2c   : > { %1154 = vmatmul.mubr.bf16.vlgmr.msra.gmra.mxu0 %v1254_v9 }
  0x2d   : > { %1159 = vmatprep.mubr.msk.bf16.mxu0 %vm1290_vm0, %v1289_v10 }
  0x8f   : > { %v737_v0 = vpop.permute.xlu0 %736 }
  0x93   : > { %v742_v3 = vpop.permute.xlu0 %741 }
  0xec   : > { %v1155_v11 = vpop.f32.mrf.mxu0 }
  0xed   : > { %1273 = vtanh.f32 %v1155_v11 }
  0xee   : > { %v469_v12 = vpop.f32.mrf.mxu0 }
  0xf0   : > { %v1156_v13 = vpop.f32.mrf.mxu0 }
  0xf1   : > { %1275 = vtanh.f32 %v1156_v13 }
  0xf2   : > { %1277 = vtanh.f32 %v469_v12  ;;  %v472_v14 = vpop.f32.mrf.mxu0 }
  0xf3   : > { %1279 = vtanh.f32 %v472_v14 }
  0xfa   : > { %v1274_v15 = vpop.eup %1273 }
  0xfe   : > { %v1276_v16 = vpop.eup %1275 }
  0xff   : > { %v1278_v18 = vpop.eup %1277  ;;  %v489_v19 = vpack.c.bf16 %v1276_v16, %v1274_v15 }
 0x100   : > { %v1280_v20 = vpop.eup %1279 }
 0x101   : > { %1164 = vmatpush3.bf16.msra.mxu1 %v489_v19  ;;  %v488_v22 = vpack.c.bf16 %v1280_v20, %v1278_v18 }
 0x102   : > { %1169 = vmatprep.subr.bf16.mxu1 %v1256_v17 }
 0x103   : > { %1158 = vmatpush3.bf16.msra.mxu0 %v488_v22 }
 0x104   : > { %1166 = vmatmul.mubr.msk.bf16.vlgmr.msra.gmra.mxu1 %vm495_vm1, %v1255_v21  ;;  %1189 = vmatprep.subr.bf16.mxu0 %v1289_v10 }
 0x105   : > { %1170 = vmatpush3.bf16.msra.mxu1 %v1256_v17 }
 0x106   : > { %1160 = vmatmul.mubr.msk.bf16.vlgmr.msra.gmra.mxu0 %vm495_vm1, %v1255_v21  ;;  %1171 = vmatprep.subr.bf16.mxu1 %v1257_v23 }
 0x107   : > { %1191 = vmatprep.mubr.msk.bf16.mxu0 %vm1290_vm0, %v1289_v10 }
 0x109   : > { %1172 = vmatpush3.bf16.msra.mxu1 %v1257_v23 }
 0x10a   : > { %1173 = vmatprep.subr.bf16.mxu1 %v1258_v24 }
 0x10d   : > { %1174 = vmatpush3.bf16.msra.mxu1 %v1258_v24 }
 0x10e   : > { %1175 = vmatprep.subr.bf16.mxu1 %v1259_v25 }
 0x111   : > { %1176 = vmatpush3.bf16.msra.mxu1 %v1259_v25 }
 0x112   : > { %1177 = vmatprep.subr.bf16.mxu1 %v1260_v26 }
 0x115   : > { %1178 = vmatpush3.bf16.msra.mxu1 %v1260_v26 }
 0x116   : > { %1179 = vmatprep.subr.bf16.mxu1 %v1261_v27 }
 0x119   : > { %1180 = vmatpush3.bf16.msra.mxu1 %v1261_v27 }
 0x11a   : > { %1181 = vmatprep.subr.bf16.mxu1 %v1262_v28 }
 0x11d   : > { %1182 = vmatpush3.bf16.msra.mxu1 %v1262_v28 }
 0x11e   : > { %1183 = vmatprep.subr.bf16.mxu1 %v1263_v29 }
 0x121   : > { %1184 = vmatpush3.bf16.msra.mxu1 %v1263_v29 }
 0x122   : > { %1201 = vmatprep.subr.bf16.mxu1 %v1265_v47 }
 0x1c4   : > { %v577_v30 = vpop.f32.mrf.mxu1 }
 0x1c5   : > { %v584_v37 = vadd.f32 %v577_v30, %v331_v33 }
 0x1c6   : > { %v533_v31 = vpop.f32.mrf.mxu0  ;;  %v1167_v32 = vpop.f32.mrf.mxu1 }
 0x1c7   : > { %v540_v41 = vadd.f32 %v533_v31, %v331_v33 }
 0x1c8   : > { %v1161_v35 = vpop.f32.mrf.mxu0  ;;  %v580_v36 = vpop.f32.mrf.mxu1 }
 0x1c9   : > { %v585_v38 = vadd.f32 %v580_v36, %v332_v34 }
 0x1ca   : > { %v536_v39 = vpop.f32.mrf.mxu0  ;;  %v1168_v40 = vpop.f32.mrf.mxu1 }
 0x1cb   : > { %v541_v42 = vadd.f32 %v536_v39, %v332_v34  ;;  %v586_v45 = vpack.c.bf16 %v585_v38, %v584_v37 }
 0x1cc   : > { %v1162_v43 = vpop.f32.mrf.mxu0 }
 0x1cd   : > { %v542_v44 = vpack.c.bf16 %v541_v42, %v540_v41 }
 0x1cf   : > { %1185 = vmatprep.mubr.bf16.mxu1 %v542_v44 }
 0x1d0   : > { %1186 = vmatmul.mubr.bf16.vlgmr.msra.gmra.mxu1 %v586_v45 }
 0x1d1   : > { %1202 = vmatpush3.bf16.msra.mxu1 %v1265_v47 }
 0x1d2   : > { %1203 = vmatprep.subr.bf16.mxu1 %v1266_v49 }
 0x1d5   : > { %1204 = vmatpush3.bf16.msra.mxu1 %v1266_v49 }
 0x1d6   : > { %1205 = vmatprep.subr.bf16.mxu1 %v1267_v51 }
 0x1d9   : > { %1206 = vmatpush3.bf16.msra.mxu1 %v1267_v51 }
 0x1da   : > { %1207 = vmatprep.subr.bf16.mxu1 %v1268_v52 }
 0x1dd   : > { %1208 = vmatpush3.bf16.msra.mxu1 %v1268_v52 }
 0x1de   : > { %1209 = vmatprep.subr.bf16.mxu1 %v1269_v60 }
 0x1e1   : > { %1210 = vmatpush3.bf16.msra.mxu1 %v1269_v60 }
 0x1e2   : > { %1211 = vmatprep.subr.bf16.mxu1 %v1270_v61 }
 0x1e5   : > { %1212 = vmatpush3.bf16.msra.mxu1 %v1270_v61 }
 0x1e6   : > { %1213 = vmatprep.subr.bf16.mxu1 %v1271_v62 }
 0x1e9   : > { %1214 = vmatpush3.bf16.msra.mxu1 %v1271_v62 }
 0x1ea   : > { %1215 = vmatprep.subr.bf16.mxu1 %v1272_v63 }
 0x1ed   : > { %1216 = vmatpush3.bf16.msra.mxu1 %v1272_v63 }
 0x290   : > { %v1187_v53 = vpop.f32.mrf.mxu1 }
 0x292   : > { %v669_v54 = vpop.f32.mrf.mxu1 }
 0x294   : > { %v1188_v55 = vpop.f32.mrf.mxu1 }
 0x295   : > { %v749_v59 = vpack.c.bf16 %v1188_v55, %v1187_v53 }
 0x296   : > { %v672_v56 = vpop.f32.mrf.mxu1 }
 0x297   : > { %v684_v57 = vpack.c.bf16 %v672_v56, %v669_v54 }
 0x299   : > { %1190 = vmatpush3.bf16.msra.mxu0 %v684_v57 }
 0x29a   : > { %1195 = vmatprep.subr.bf16.mxu0 %v1289_v10 }
 0x29c   : > { %1192 = vmatmul.mubr.msk.bf16.vlgmr.msra.gmra.mxu0 %vm495_vm1, %v1264_v58 }
 0x29d   : > { %1196 = vmatpush3.bf16.msra.mxu0 %v749_v59  ;;  %1197 = vmatprep.mubr.msk.bf16.mxu0 %vm1290_vm0, %v1289_v10 }
 0x29e   : > { %1221 = vmatprep.subr.bf16.mxu0 %v1289_v10 }
 0x2a4   : > { %1198 = vmatmul.mubr.msk.bf16.vlgmr.msra.gmra.mxu0 %vm495_vm1, %v1264_v58 }
 0x2a5   : > { %1223 = vmatprep.mubr.msk.bf16.mxu0 %vm1290_vm0, %v1289_v10 }
 0x35c   : > { %v727_v1 = vpop.f32.mrf.mxu0 }
 0x35d   : > { %v744_v4 = vmul.f32 %v737_v0, %v727_v1 }
 0x35e   : > { %v1193_v2 = vpop.f32.mrf.mxu0 }
 0x35f   : > { %v746_v8 = vmax.f32 %v744_v4, 0.0 }
 0x360   : > { %v730_v5 = vpop.f32.mrf.mxu0 }
 0x361   : > { %v745_v6 = vmul.f32 %v742_v3, %v730_v5 }
 0x362   : > { %v1194_v7 = vpop.f32.mrf.mxu0 }
 0x363   : > { %v747_v9 = vmax.f32 %v745_v6, 0.0 }
 0x364   : > { %v784_v11 = vpop.f32.mrf.mxu0 }
 0x365   : > { %v748_v12 = vpack.c.bf16 %v747_v9, %v746_v8  ;;  %v791_v14 = vmul.f32 %v784_v11, %v737_v0 }
 0x366   : > { %v1199_v13 = vpop.f32.mrf.mxu0 }
 0x367   : > { %1217 = vmatprep.mubr.bf16.mxu1 %v748_v12  ;;  %v793_v18 = vmax.f32 %v791_v14, 0.0 }
 0x368   : > { %v787_v15 = vpop.f32.mrf.mxu0 }
 0x369   : > { %v792_v16 = vmul.f32 %v787_v15, %v742_v3 }
 0x36a   : > { %v1200_v17 = vpop.f32.mrf.mxu0 }
 0x36b   : > { %v794_v19 = vmax.f32 %v792_v16, 0.0 }
 0x36d   : > { %v795_v20 = vpack.c.bf16 %v794_v19, %v793_v18 }
 0x36f   : > { %1218 = vmatmul.mubr.bf16.vlgmr.msra.gmra.mxu1 %v795_v20 }
 0x42f   : > { %v1219_v21 = vpop.f32.mrf.mxu1 }
 0x431   : > { %v878_v22 = vpop.f32.mrf.mxu1 }
 0x433   : > { %v1220_v23 = vpop.f32.mrf.mxu1 }
 0x434   : > { %v939_v26 = vpack.c.bf16 %v1220_v23, %v1219_v21 }
 0x435   : > { %v881_v24 = vpop.f32.mrf.mxu1 }
 0x436   : > { %v893_v25 = vpack.c.bf16 %v881_v24, %v878_v22 }
 0x438   : > { %1222 = vmatpush3.bf16.msra.mxu0 %v893_v25 }
 0x439   : > { %1227 = vmatprep.subr.bf16.mxu0 %v1289_v10 }
 0x43b   : > { %1224 = vmatmul.mubr.msk.bf16.vlgmr.msra.gmra.mxu0 %vm495_vm1, %v1264_v58 }
 0x43c   : > { %1228 = vmatpush3.bf16.msra.mxu0 %v939_v26  ;;  %1229 = vmatprep.mubr.msk.bf16.mxu0 %vm1290_vm0, %v1289_v10 }
 0x443   : > { %1230 = vmatmul.mubr.msk.bf16.vlgmr.msra.gmra.mxu0 %vm495_vm1, %v1264_v58 }
 0x4fb   : > { %v928_v27 = vpop.f32.mrf.mxu0 }
 0x4fc   : > { %v935_v28 = vmul.f32 %v928_v27, %v737_v0 }
 0x4fd   : > { %v1225_v29 = vpop.f32.mrf.mxu0 }
 0x4fe   : > { %937 = vst [vmem:[%s312_s15] sm:$0xff] %v935_v28 }
 0x4ff   : > { %v931_v30 = vpop.f32.mrf.mxu0 }
 0x500   : > { %v936_v31 = vmul.f32 %v931_v30, %v742_v3 }
 0x501   : > { %v1226_v32 = vpop.f32.mrf.mxu0 }
 0x502   : > { %938 = vst [vmem:[%s312_s15 + $0x8] sm:$0xff] %v936_v31 }
 0x503   : > { %v974_v33 = vpop.f32.mrf.mxu0 }
 0x504   : > { %v981_v34 = vmul.f32 %v974_v33, %v737_v0 }
 0x505   : > { %v1231_v35 = vpop.f32.mrf.mxu0 }
 0x506   : > { %1089 = vst [vmem:[%s312_s15 + $0x10] sm:$0xff] %v981_v34 }
 0x507   : > { %v977_v10 = vpop.f32.mrf.mxu0 }
 0x508   : > { %v982_v36 = vmul.f32 %v977_v10, %v742_v3 }
 0x509   : > { %v1232_v37 = vpop.f32.mrf.mxu0 }
 0x50a   : > { %1090 = vst [vmem:[%s312_s15 + $0x18] sm:$0xff] %v982_v36 }
 0x50b PF: > { %s18_s27 = sadd.s32 1, %s1287_s27  }
 0x50c   : > { %p15_p4 = scmp.ge.s32.totalorder %s18_s27, 4  }
 0x50e   :  { %17 = sbr.rel (!%p15_p4) target bundleno = 1 (0x1), region = 83 }

</bundles_post_ra>
